<compile_context>
chip_gen: v7x
topology: tpu7x:2x2x1
jax: 0.10.0
libtpu: 0.0.40
codegen_flags: <defaults>
</compile_context>

<pallas_src>
import functools

import jax
import jax.numpy as jnp
from jax.experimental import pallas as pl
from jax.experimental.pallas import tpu as pltpu


_LANE = 128
_SUBLANE = 8
_VMEM_SPEC = pl.BlockSpec(memory_space=pltpu.MemorySpace.VMEM)


def _round_up(x, m):
    return ((x + m - 1) // m) * m


def _pad2(a, row_mult, col_mult):
    r, c = a.shape
    rp, cp = _round_up(r, row_mult), _round_up(c, col_mult)
    if (rp, cp) == (r, c):
        return a
    return jnp.pad(a, ((0, rp - r), (0, cp - c)))


# ---------------------------------------------------------------------------
# Fused Pallas kernel: every GNN layer + decoder in one launch.
# ---------------------------------------------------------------------------
def _fused_gnn_kernel(*refs, n_layers):
    adjT_ref, xT_ref, esumT_ref = refs[0], refs[1], refs[2]
    layer_refs = refs[3:3 + 3 * n_layers]
    decW_ref = refs[3 + 3 * n_layers]
    decB_ref = refs[4 + 3 * n_layers]
    out_ref = refs[5 + 3 * n_layers]

    adjT = adjT_ref[...]                    # [Npad, Npad] bf16, (1+eps) on diag
    esumT = esumT_ref[...]                  # [Ed_pad, Npad] f32
    h = xT_ref[...]                         # [Din_pad, Npad] f32

    for li in range(n_layers):
        weT = layer_refs[3 * li][...]       # [Din_pad, Ed_pad]
        wT = layer_refs[3 * li + 1][...]    # [Dout_pad, Din_pad]
        bT = layer_refs[3 * li + 2][...]    # [Dout_pad, 1]

        # Neighbor aggregation + (1+eps) self term (folded into adjT's diag).
        # bf16 MXU inputs, f32 accumulation; output is lane-dense [Din, Npad].
        m = jnp.dot(h.astype(jnp.bfloat16), adjT,
                    preferred_element_type=jnp.float32)
        # Aggregated edge features projected into this layer's input space.
        m = m + jnp.dot(weT, esumT, preferred_element_type=jnp.float32)
        # Layer linear transform + bias -> lane-dense [Dout, Npad].
        h_new = jnp.dot(wT, m, preferred_element_type=jnp.float32) + bT
        if li < n_layers - 1:
            h_new = jnp.maximum(h_new, 0.0)
        # TODO(synk): dropout(dropout_rate) is identity in eval mode; omitted.
        h = h_new

    # Decoder epilogue: sigmoid(Wd^T @ h + bd) emitted as a lane-dense row.
    logits = jnp.dot(decW_ref[...], h,
                     preferred_element_type=jnp.float32) + decB_ref[...]
    out_ref[...] = jax.nn.sigmoid(logits).astype(out_ref.dtype)


def fused_gnn_decoder(adjT, xT, esumT, layer_params_t, dec_wT, dec_bT):
    """One pallas_call running every GNN layer plus the decoder."""
    n_layers = len(layer_params_t)
    n_pad = adjT.shape[0]
    args = [adjT, xT, esumT]
    for weT, wT, bT in layer_params_t:
        args += [weT, wT, bT]
    args += [dec_wT, dec_bT]

    kern = functools.partial(_fused_gnn_kernel, n_layers=n_layers)
    return pl.pallas_call(
        kern,
        out_shape=jax.ShapeDtypeStruct((1, n_pad), jnp.float32),
        in_specs=[_VMEM_SPEC] * len(args),
        out_specs=_VMEM_SPEC,
        compiler_params=pltpu.CompilerParams(
            vmem_limit_bytes=32 * 1024 * 1024),
    )(*args)


# ---------------------------------------------------------------------------
# GNN_only model (parameters + forward), mirroring the PyTorch module
# ---------------------------------------------------------------------------
def init_params(key, *, gnn_input_dim, gnn_embedding_dim, gnn_output_dim,
                gnn_layers, edge_dim):
    """Deterministic parameter init (synthetic; not a checkpoint load)."""
    dims = ([gnn_input_dim]
            + [gnn_embedding_dim] * (gnn_layers - 1)
            + [gnn_output_dim])
    params = {"layers": []}
    for li in range(gnn_layers):
        d_in, d_out = dims[li], dims[li + 1]
        key, k1, k2, k3 = jax.random.split(key, 4)
        params["layers"].append({
            "W": jax.random.normal(k1, (d_in, d_out), jnp.float32)
                 * (1.0 / jnp.sqrt(d_in)),
            "b": jnp.zeros((1, d_out), jnp.float32),
            "We": jax.random.normal(k2, (edge_dim, d_in), jnp.float32)
                  * (1.0 / jnp.sqrt(edge_dim)),
        })
    key, kd = jax.random.split(key)
    params["dec_W"] = jax.random.normal(kd, (gnn_output_dim, 1), jnp.float32) \
                      * (1.0 / jnp.sqrt(gnn_output_dim))
    params["dec_b"] = jnp.zeros((1, 1), jnp.float32)
    return params


@jax.jit
def _forward_impl(params, x, edge_index, edge_attr, eps):
    """Device-side forward: glue (scatters / pads) fused under jit + kernel."""
    x = x.astype(jnp.float32)
    edge_index = edge_index.astype(jnp.int32)
    edge_attr = edge_attr.astype(jnp.float32)

    n, _ = x.shape
    src, dst = edge_index[0], edge_index[1]
    n_pad = _round_up(max(n, _LANE), _LANE)

    # Glue (scatter, done once): dense adjacency A[dst, src] = 1 with the GIN
    # (1+eps) self term scatter-added on the diagonal (no eye materialized);
    # stored transposed in bf16 (halves adjacency VMEM/HBM traffic, bf16 MXU
    # inputs, exact for small integer counts + (1+eps)).
    diag = jnp.arange(n_pad, dtype=jnp.int32)
    adj = (jnp.zeros((n_pad, n_pad), jnp.float32)
           .at[dst, src].add(1.0)
           .at[diag, diag].add(1.0 + eps))
    adjT = adj.T.astype(jnp.bfloat16)

    # Glue: per-node sum of incoming edge features (segment_sum scatter),
    # transposed to feature-major and padded to lane/sublane multiples.
    edge_dim = edge_attr.shape[1]
    esum = jnp.zeros((n_pad, edge_dim), jnp.float32).at[dst].add(edge_attr)
    esumT = _pad2(esum.T, _SUBLANE, _LANE)          # [Ed_pad, n_pad]
    xT = _pad2(x.T, _SUBLANE, _LANE)                # [Din_pad, n_pad]

    # One-time transpose + pad of parameters to the feature-major layout.
    layer_params_t = []
    for lp in params["layers"]:
        layer_params_t.append((
            _pad2(lp["We"].T, _SUBLANE, _SUBLANE),  # [Din_pad, Ed_pad]
            _pad2(lp["W"].T, _SUBLANE, _SUBLANE),   # [Dout_pad, Din_pad]
            _pad2(lp["b"].T, _SUBLANE, 1),          # [Dout_pad, 1]
        ))
    dec_wT = _pad2(params["dec_W"].T, 1, _SUBLANE)  # [1, Dout_pad]
    dec_bT = params["dec_b"].T                      # [1, 1]

    scores_row = fused_gnn_decoder(adjT, xT, esumT, layer_params_t,
                                   dec_wT, dec_bT)
    return scores_row[0, :n]


def gnn_only_forward(params, data, *, eps):
    """Equivalent of GNN_only.forward_call(data, device).

    data: dict with 'x' [N, Fin] float, 'edge_index' [2, E] int,
          'edge_attr' [E, edge_dim] float, 'y' [N] labels.
    Returns (scores, labels, h0=None, synth_index=[]).
    """
    labs = data["y"].astype(jnp.float32)
    scores = _forward_impl(params, data["x"], data["edge_index"],
                           data["edge_attr"], jnp.float32(eps))
    h0 = None
    synth_index = []
    return scores, labs, h0, synth_index


# ---------------------------------------------------------------------------
if __name__ == "__main__":
    # Hyperparameters consistent with GNN_only.__init__ signature.
    gnn_input_dim = 8
    gnn_embedding_dim = 32
    gnn_output_dim = 16
    gnn_layers = 3
    edge_dim = 4
    eps = 0.0          # GIN eps (train_eps=False -> fixed)
    # heads, dropout_rate, search_depth: unused in eval-mode forward.

    N = 16             # nodes
    E = 48             # edges

    key = jax.random.PRNGKey(0)
    kx, ke, ka, ky, kp = jax.random.split(key, 5)

    data = {
        "x": jax.random.normal(kx, (N, gnn_input_dim), jnp.float32),
        "edge_index": jax.random.randint(ke, (2, E), 0, N, jnp.int32),
        "edge_attr": jax.random.normal(ka, (E, edge_dim), jnp.float32),
        "y": jax.random.randint(ky, (N,), 0, 2, jnp.int32),
    }

    params = init_params(
        kp,
        gnn_input_dim=gnn_input_dim,
        gnn_embedding_dim=gnn_embedding_dim,
        gnn_output_dim=gnn_output_dim,
        gnn_layers=gnn_layers,
        edge_dim=edge_dim,
    )

    scores, labels, h0, synth_index = gnn_only_forward(params, data, eps=eps)
    jax.block_until_ready(scores)
    jax.block_until_ready(labels)

    assert scores.shape == (N,)
    assert labels.shape == (N,)
    assert bool(jnp.all(jnp.isfinite(scores)))
    assert h0 is None and synth_index == []
    print("KERNEL_OK")
</pallas_src>

<mosaic_0001>
module attributes {stable_mosaic.version = 11 : i64} {
  func.func private @main(%arg0: i32) attributes {dimension_semantics = [#tpu.dimension_semantics<core_parallel>], iteration_bounds = array<i64: 2>, tpu.core_type = #tpu.core_type<sc_scalar_subcore>, window_params = []} {
    return
  }
}

module attributes {stable_mosaic.version = 11 : i64} {
  func.func private @main(%arg0: i32) attributes {dimension_semantics = [#tpu.dimension_semantics<core_parallel>], iteration_bounds = array<i64: 2>, tpu.core_type = #tpu.core_type<sc_scalar_subcore>, window_params = []} {
    return
  }
}

module attributes {stable_mosaic.version = 11 : i64} {
  func.func @_fused_gnn_kernel(%arg0: memref<128x128xbf16, #tpu.memory_space<vmem>>, %arg1: memref<8x128xf32, #tpu.memory_space<vmem>>, %arg2: memref<8x128xf32, #tpu.memory_space<vmem>>, %arg3: memref<8x8xf32, #tpu.memory_space<vmem>>, %arg4: memref<32x8xf32, #tpu.memory_space<vmem>>, %arg5: memref<32x1xf32, #tpu.memory_space<vmem>>, %arg6: memref<32x8xf32, #tpu.memory_space<vmem>>, %arg7: memref<32x32xf32, #tpu.memory_space<vmem>>, %arg8: memref<32x1xf32, #tpu.memory_space<vmem>>, %arg9: memref<32x8xf32, #tpu.memory_space<vmem>>, %arg10: memref<16x32xf32, #tpu.memory_space<vmem>>, %arg11: memref<16x1xf32, #tpu.memory_space<vmem>>, %arg12: memref<1x16xf32, #tpu.memory_space<vmem>>, %arg13: memref<1x1xf32, #tpu.memory_space<vmem>>, %arg14: memref<1x128xf32, #tpu.memory_space<vmem>>) attributes {dimension_semantics = [], scalar_prefetch = 0 : i64, scratch_operands = 0 : i64, tpu.core_type = #tpu.core_type<tc>} {
    %c0 = arith.constant 0 : index
    %c0_0 = arith.constant 0 : index
    %0 = vector.load %arg0[%c0, %c0_0] : memref<128x128xbf16, #tpu.memory_space<vmem>>, vector<128x128xbf16>
    %c0_1 = arith.constant 0 : index
    %c0_2 = arith.constant 0 : index
    %1 = vector.load %arg2[%c0_1, %c0_2] : memref<8x128xf32, #tpu.memory_space<vmem>>, vector<8x128xf32>
    %c0_3 = arith.constant 0 : index
    %c0_4 = arith.constant 0 : index
    %2 = vector.load %arg1[%c0_3, %c0_4] : memref<8x128xf32, #tpu.memory_space<vmem>>, vector<8x128xf32>
    %c0_5 = arith.constant 0 : index
    %c0_6 = arith.constant 0 : index
    %3 = vector.load %arg3[%c0_5, %c0_6] : memref<8x8xf32, #tpu.memory_space<vmem>>, vector<8x8xf32>
    %c0_7 = arith.constant 0 : index
    %c0_8 = arith.constant 0 : index
    %4 = vector.load %arg4[%c0_7, %c0_8] : memref<32x8xf32, #tpu.memory_space<vmem>>, vector<32x8xf32>
    %c0_9 = arith.constant 0 : index
    %c0_10 = arith.constant 0 : index
    %5 = vector.load %arg5[%c0_9, %c0_10] : memref<32x1xf32, #tpu.memory_space<vmem>>, vector<32x1xf32>
    %6 = arith.truncf %2 : vector<8x128xf32> to vector<8x128xbf16>
    %cst = arith.constant dense<0.000000e+00> : vector<8x128xf32>
    %7 = tpu.matmul %6, %0, %cst {dimension_numbers = #tpu.dot_dimension_numbers<[1], [0], [0], [1], [0, 0, 1, 1], [], []>} : vector<8x128xbf16>, vector<128x128xbf16>, vector<8x128xf32> -> vector<8x128xf32>
    %cst_11 = arith.constant dense<0.000000e+00> : vector<8x128xf32>
    %8 = tpu.matmul %3, %1, %cst_11 {dimension_numbers = #tpu.dot_dimension_numbers<[1], [0], [0], [1], [0, 0, 1, 1], [], []>} : vector<8x8xf32>, vector<8x128xf32>, vector<8x128xf32> -> vector<8x128xf32>
    %9 = arith.addf %7, %8 : vector<8x128xf32>
    %cst_12 = arith.constant dense<0.000000e+00> : vector<32x128xf32>
    %10 = tpu.matmul %4, %9, %cst_12 {dimension_numbers = #tpu.dot_dimension_numbers<[1], [0], [0], [1], [0, 0, 1, 1], [], []>} : vector<32x8xf32>, vector<8x128xf32>, vector<32x128xf32> -> vector<32x128xf32>
    %11 = vector.broadcast %5 : vector<32x1xf32> to vector<32x128xf32>
    %12 = arith.addf %10, %11 : vector<32x128xf32>
    %cst_13 = arith.constant 0.000000e+00 : f32
    %13 = vector.broadcast %cst_13 : f32 to vector<32x128xf32>
    %14 = arith.maximumf %12, %13 : vector<32x128xf32>
    %c0_14 = arith.constant 0 : index
    %c0_15 = arith.constant 0 : index
    %15 = vector.load %arg6[%c0_14, %c0_15] : memref<32x8xf32, #tpu.memory_space<vmem>>, vector<32x8xf32>
    %c0_16 = arith.constant 0 : index
    %c0_17 = arith.constant 0 : index
    %16 = vector.load %arg7[%c0_16, %c0_17] : memref<32x32xf32, #tpu.memory_space<vmem>>, vector<32x32xf32>
    %c0_18 = arith.constant 0 : index
    %c0_19 = arith.constant 0 : index
    %17 = vector.load %arg8[%c0_18, %c0_19] : memref<32x1xf32, #tpu.memory_space<vmem>>, vector<32x1xf32>
    %18 = arith.truncf %14 : vector<32x128xf32> to vector<32x128xbf16>
    %cst_20 = arith.constant dense<0.000000e+00> : vector<32x128xf32>
    %19 = tpu.matmul %18, %0, %cst_20 {dimension_numbers = #tpu.dot_dimension_numbers<[1], [0], [0], [1], [0, 0, 1, 1], [], []>} : vector<32x128xbf16>, vector<128x128xbf16>, vector<32x128xf32> -> vector<32x128xf32>
    %cst_21 = arith.constant dense<0.000000e+00> : vector<32x128xf32>
    %20 = tpu.matmul %15, %1, %cst_21 {dimension_numbers = #tpu.dot_dimension_numbers<[1], [0], [0], [1], [0, 0, 1, 1], [], []>} : vector<32x8xf32>, vector<8x128xf32>, vector<32x128xf32> -> vector<32x128xf32>
    %21 = arith.addf %19, %20 : vector<32x128xf32>
    %cst_22 = arith.constant dense<0.000000e+00> : vector<32x128xf32>
    %22 = tpu.matmul %16, %21, %cst_22 {dimension_numbers = #tpu.dot_dimension_numbers<[1], [0], [0], [1], [0, 0, 1, 1], [], []>} : vector<32x32xf32>, vector<32x128xf32>, vector<32x128xf32> -> vector<32x128xf32>
    %23 = vector.broadcast %17 : vector<32x1xf32> to vector<32x128xf32>
    %24 = arith.addf %22, %23 : vector<32x128xf32>
    %cst_23 = arith.constant 0.000000e+00 : f32
    %25 = vector.broadcast %cst_23 : f32 to vector<32x128xf32>
    %26 = arith.maximumf %24, %25 : vector<32x128xf32>
    %c0_24 = arith.constant 0 : index
    %c0_25 = arith.constant 0 : index
    %27 = vector.load %arg9[%c0_24, %c0_25] : memref<32x8xf32, #tpu.memory_space<vmem>>, vector<32x8xf32>
    %c0_26 = arith.constant 0 : index
    %c0_27 = arith.constant 0 : index
    %28 = vector.load %arg10[%c0_26, %c0_27] : memref<16x32xf32, #tpu.memory_space<vmem>>, vector<16x32xf32>
    %c0_28 = arith.constant 0 : index
    %c0_29 = arith.constant 0 : index
    %29 = vector.load %arg11[%c0_28, %c0_29] : memref<16x1xf32, #tpu.memory_space<vmem>>, vector<16x1xf32>
    %30 = arith.truncf %26 : vector<32x128xf32> to vector<32x128xbf16>
    %cst_30 = arith.constant dense<0.000000e+00> : vector<32x128xf32>
    %31 = tpu.matmul %30, %0, %cst_30 {dimension_numbers = #tpu.dot_dimension_numbers<[1], [0], [0], [1], [0, 0, 1, 1], [], []>} : vector<32x128xbf16>, vector<128x128xbf16>, vector<32x128xf32> -> vector<32x128xf32>
    %cst_31 = arith.constant dense<0.000000e+00> : vector<32x128xf32>
    %32 = tpu.matmul %27, %1, %cst_31 {dimension_numbers = #tpu.dot_dimension_numbers<[1], [0], [0], [1], [0, 0, 1, 1], [], []>} : vector<32x8xf32>, vector<8x128xf32>, vector<32x128xf32> -> vector<32x128xf32>
    %33 = arith.addf %31, %32 : vector<32x128xf32>
    %cst_32 = arith.constant dense<0.000000e+00> : vector<16x128xf32>
    %34 = tpu.matmul %28, %33, %cst_32 {dimension_numbers = #tpu.dot_dimension_numbers<[1], [0], [0], [1], [0, 0, 1, 1], [], []>} : vector<16x32xf32>, vector<32x128xf32>, vector<16x128xf32> -> vector<16x128xf32>
    %35 = vector.broadcast %29 : vector<16x1xf32> to vector<16x128xf32>
    %36 = arith.addf %34, %35 : vector<16x128xf32>
    %c0_33 = arith.constant 0 : index
    %c0_34 = arith.constant 0 : index
    %37 = vector.load %arg12[%c0_33, %c0_34] : memref<1x16xf32, #tpu.memory_space<vmem>>, vector<1x16xf32>
    %cst_35 = arith.constant dense<0.000000e+00> : vector<1x128xf32>
    %38 = tpu.matmul %37, %36, %cst_35 {dimension_numbers = #tpu.dot_dimension_numbers<[1], [0], [0], [1], [0, 0, 1, 1], [], []>} : vector<1x16xf32>, vector<16x128xf32>, vector<1x128xf32> -> vector<1x128xf32>
    %c0_36 = arith.constant 0 : index
    %c0_37 = arith.constant 0 : index
    %39 = vector.load %arg13[%c0_36, %c0_37] : memref<1x1xf32, #tpu.memory_space<vmem>>, vector<1x1xf32>
    %40 = vector.broadcast %39 : vector<1x1xf32> to vector<1x128xf32>
    %41 = arith.addf %38, %40 : vector<1x128xf32>
    %42 = arith.negf %41 : vector<1x128xf32>
    %43 = math.exp %42 : vector<1x128xf32>
    %cst_38 = arith.constant 1.000000e+00 : f32
    %44 = vector.broadcast %cst_38 : f32 to vector<1x128xf32>
    %45 = arith.addf %44, %43 : vector<1x128xf32>
    %46 = arith.divf %44, %45 : vector<1x128xf32>
    %c0_39 = arith.constant 0 : index
    %c0_40 = arith.constant 0 : index
    %47 = vector.load %arg14[%c0_39, %c0_40] : memref<1x128xf32, #tpu.memory_space<vmem>>, vector<1x128xf32>
    tpu.vector_store %arg14[%c0_39, %c0_40], %46 {strides = array<i32>} : memref<1x128xf32, #tpu.memory_space<vmem>>, vector<1x128xf32>,
    return
  }
}

</mosaic_0001>

<bundles_post_ra>
// kernel: _forward_impl.1
= control target key start
LH: loop header
LB: loop body
LE: loop exit
PB: predicated region body
PF: predicated region fallthrough
CT: control target
= control target key end

     0   :  { %vm78_vm0 = vcmask 64512   ;;  %v1236_v0 = vmov 0.0   ;;  %vm1237_vm1 = vmmov 0   ;;  %v1238_v14 = vmov 0   ;;  %s1538_s2 = inlined_call_operand.vmem [shape: f32[8,128], index: 2, kind: input, shape index: {}]   ;;  %s1539_s3 = inlined_call_operand.vmem [shape: f32[8,8], index: 3, kind: input, shape index: {}]   ;;  %s1540_s0 = inlined_call_operand.vmem [shape: bf16[128,128], index: 0, kind: input, shape index: {}]   ;;  %s1541_s1 = inlined_call_operand.vmem [shape: f32[8,128], index: 1, kind: input, shape index: {}]   ;;  %s1542_s4 = inlined_call_operand.vmem [shape: f32[32,8], index: 4, kind: input, shape index: {}]   ;;  %s1543_s5 = inlined_call_operand.vmem [shape: f32[32,1], index: 5, kind: input, shape index: {}]   ;;  %s1544_s13 = inlined_call_operand.<no memory space> [shape: f32[1,1], index: 13, kind: input, shape index: {}]   ;;  %s1545_s6 = inlined_call_operand.vmem [shape: f32[32,8], index: 6, kind: input, shape index: {}]   ;;  %s1546_s8 = inlined_call_operand.vmem [shape: f32[32,1], index: 8, kind: input, shape index: {}]   ;;  %s1547_s11 = inlined_call_operand.vmem [shape: f32[16,1], index: 11, kind: input, shape index: {}]   ;;  %s1548_s7 = inlined_call_operand.vmem [shape: f32[32,32], index: 7, kind: input, shape index: {}]   ;;  %s1549_s9 = inlined_call_operand.vmem [shape: f32[32,8], index: 9, kind: input, shape index: {}]   ;;  %s1550_s10 = inlined_call_operand.vmem [shape: f32[16,32], index: 10, kind: input, shape index: {}]   ;;  %s1551_s12 = inlined_call_operand.vmem [shape: f32[1,16], index: 12, kind: input, shape index: {}]   ;;  %s1552_s14 = inlined_call_operand.vmem [shape: f32[1,128], index: 14, kind: output, shape index: {}]  }
   0x1   :  { %1078 = vmatprep.subr.mxu1 %v1236_v0  ;;  %v1319_v1 = vld [vmem:[%s1538_s2] sm:$0xff]  ;;  %1080 = vmatprep.mubr.msk.f32.mxu1 %vm1237_vm1, %v1236_v0  ;;  %v1339_v4 = vld [vmem:[%s1540_s0 + $0x8] sm:$0xff]   ;;  %v1350_v5 = vld [vmem:[%s1540_s0 + $0x10] sm:$0xff]   ;;  %v19_v17 = vstv %s1544_s13  ;;  %vm541_vm2 = vcmask 261120   ;;  %vm901_vm3 = vcmask 130048  }
   0x2   :  { %v68_v2 = vld [vmem:[%s1539_s3] sm:$0xff]  ;;  %1079 = vmatpush3.msra.mxu1 %v1319_v1  ;;  %1111 = vmatprep.subr.mxu0 %v1319_v1  ;;  %v1357_v6 = vld [vmem:[%s1540_s0 + $0x18] sm:$0xff]   ;;  %v1371_v8 = vld [vmem:[%s1540_s0 + $0x28] sm:$0xff]   ;;  %20 = vst [vmem:[#allocation2] sm:$0x1] %v19_v17 }
   0x3   :  { %v1330_v3 = vld [vmem:[%s1540_s0] sm:$0xff]   ;;  %1081 = vmatmul.mubr.msk.f32.vlgmr.msra.gmra.mrb[0].mxu1 %vm78_vm0, %v68_v2  ;;  %1083 = vmatprep.subr.bf16.mxu1 %v1236_v0  ;;  %v1378_v9 = vld [vmem:[%s1540_s0 + $0x30] sm:$0xff]   ;;  %v1385_v10 = vld [vmem:[%s1540_s0 + $0x38] sm:$0xff]  }
   0x4   :  { %1084 = vmatpush3.bf16.msra.mxu1 %v1330_v3  ;;  %1099 = vmatprep.mubr.msk.bf16.mxu1 %vm1237_vm1, %v1236_v0  ;;  %v1364_v7 = vld [vmem:[%s1540_s0 + $0x20] sm:$0xff]   ;;  %v75_v16 = vld [vmem:[%s1543_s5 + $0x10] sm:$0xff]  ;;  %v74_v18 = vld [vmem:[%s1543_s5 + $0x8] sm:$0xff] }
   0x5   :  { %1085 = vmatprep.subr.bf16.mxu1 %v1236_v0  ;;  %1112 = vmatpush3.msra.mxu0 %v1319_v1  ;;  %v67_v11 = vld [vmem:[%s1541_s1] sm:$0xff]  ;;  %v76_v19 = vld [vmem:[%s1543_s5 + $0x18] sm:$0xff]  ;;  %v362_v21 = vld [vmem:[%s1545_s6 + $0x8] sm:$0xff] }
   0x6   :  { %1119 = vmatprep.subr.bf16.mxu0 %v1330_v3  ;;  %v77_v12 = vpack.c.bf16 %v67_v11, %v67_v11  ;;  %v69_v13 = vld [vmem:[%s1542_s4] sm:$0xff]  ;;  %1222 = vset.pattern.permute.xlu0 %v1238_v14  ;;  %v370_v23 = vld [vmem:[%s1546_s8 + $0x8] sm:$0xff]  ;;  %v371_v24 = vld [vmem:[%s1546_s8 + $0x10] sm:$0xff] }
   0x7   :  { %v73_v15 = vld [vmem:[%s1543_s5] sm:$0xff]  ;;  %1223 = vset.pattern.permute.xlu1 %v1238_v14  ;;  %v372_v25 = vld [vmem:[%s1546_s8 + $0x18] sm:$0xff]  ;;  %v650_v27 = vld [vmem:[%s1547_s11 + $0x8] sm:$0xff] }
   0x8   :  { %1086 = vmatpush3.bf16.msra.mxu1 %v1339_v4  ;;  %242 = vperm.xlu0 %1222, %v73_v15   ;;  %v361_v20 = vld [vmem:[%s1545_s6] sm:$0xff]  ;;  %v70_v35 = vld [vmem:[%s1542_s4 + $0x8] sm:$0xff]  ;;  %v71_v37 = vld [vmem:[%s1542_s4 + $0x10] sm:$0xff] }
   0x9   :  { %1087 = vmatprep.subr.bf16.mxu1 %v1236_v0  ;;  %252 = vperm.xlu1 %1223, %v75_v16   ;;  %v369_v22 = vld [vmem:[%s1546_s8] sm:$0xff]  ;;  %v72_v38 = vld [vmem:[%s1542_s4 + $0x18] sm:$0xff]  ;;  %v363_v39 = vld [vmem:[%s1545_s6 + $0x10] sm:$0xff] }
   0xa   :  { %1113 = vmatprep.mubr.msk.f32.mxu0 %vm78_vm0, %v361_v20  ;;  %v649_v26 = vld [vmem:[%s1547_s11] sm:$0xff]  ;;  %v364_v40 = vld [vmem:[%s1545_s6 + $0x18] sm:$0xff]  ;;  %v644_v16 = vld [vmem:[%s1549_s9 + $0x8] sm:$0xff] }
   0xb   :  { %1114 = vmatmul.mubr.msk.f32.vlgmr.msra.gmra.mrb[0].mxu0 %vm78_vm0, %v362_v21  ;;  %v891_v28 = vld [vmem:[#allocation2] sm:$0x1]  ;;  %v368_v14 = vld [vmem:[%s1548_s7 + $0x18] sm:$0xff]  ;;  %v645_v17 = vld [vmem:[%s1549_s9 + $0x10] sm:$0xff] }
   0xc   :  { %1088 = vmatpush3.bf16.msra.mxu1 %v1350_v5  ;;  %247 = vperm.xlu0 %1222, %v74_v18   ;;  %v365_v63 = vld [vmem:[%s1548_s7] sm:$0xff] }
   0xd   :  { %1089 = vmatprep.subr.bf16.mxu1 %v1236_v0  ;;  %257 = vperm.xlu1 %1223, %v76_v19   ;;  %v643_v15 = vld [vmem:[%s1549_s9] sm:$0xff] }
   0xe   :  { %1120 = vmatpush3.bf16.msra.mxu0 %v1330_v3  ;;  %1116 = vmatprep.mubr.msk.f32.mxu0 %vm78_vm0, %v363_v39 }
   0xf   :  { %1121 = vmatprep.subr.bf16.mxu0 %v1339_v4  ;;  %1117 = vmatmul.mubr.msk.f32.gmra.mrb[2].mxu0 %vm78_vm0, %v364_v40  ;;  %v647_v40 = vld [vmem:[%s1550_s10] sm:$0xff] }
  0x10   :  { %1090 = vmatpush3.bf16.msra.mxu1 %v1357_v6  ;;  %523 = vperm.xlu0 %1222, %v369_v22  }
  0x11   :  { %1091 = vmatprep.subr.bf16.mxu1 %v1236_v0  ;;  %528 = vperm.xlu1 %1223, %v370_v23  }
  0x12   :  { %1122 = vmatpush3.bf16.msra.mxu0 %v1339_v4 }
  0x13   :  { %1123 = vmatprep.subr.bf16.mxu0 %v1350_v5 }
  0x14   :  { %1092 = vmatpush3.bf16.msra.mxu1 %v1364_v7  ;;  %533 = vperm.xlu0 %1222, %v371_v24  }
  0x15   :  { %1093 = vmatprep.subr.bf16.mxu1 %v1236_v0  ;;  %538 = vperm.xlu1 %1223, %v372_v25  }
  0x16   :  { %1124 = vmatpush3.bf16.msra.mxu0 %v1350_v5 }
  0x17   :  { %1125 = vmatprep.subr.bf16.mxu0 %v1357_v6 }
  0x18   :  { %1094 = vmatpush3.bf16.msra.mxu1 %v1371_v8  ;;  %801 = vperm.xlu0 %1222, %v649_v26  }
  0x19   :  { %1095 = vmatprep.subr.bf16.mxu1 %v1236_v0  ;;  %806 = vperm.xlu1 %1223, %v650_v27  }
  0x1a   :  { %1126 = vmatpush3.bf16.msra.mxu0 %v1357_v6 }
  0x1b   :  { %1127 = vmatprep.subr.bf16.mxu0 %v1364_v7 }
  0x1c   :  { %1096 = vmatpush3.bf16.msra.mxu1 %v1378_v9  ;;  %894 = vperm.xlu0 %1222, %v891_v28  }
  0x1d   :  { %1097 = vmatprep.subr.bf16.mxu1 %v1236_v0 }
  0x1e   :  { %1128 = vmatpush3.bf16.msra.mxu0 %v1364_v7 }
  0x1f   :  { %1129 = vmatprep.subr.bf16.mxu0 %v1371_v8 }
  0x20   :  { %1098 = vmatpush3.bf16.msra.mxu1 %v1385_v10 }
  0x22   :  { %1130 = vmatpush3.bf16.msra.mxu0 %v1371_v8 }
  0x23   :  { %1100 = vmatmul.mubr.bf16.vlgmr.msra.gmra.mrb[4].mxu1 %v77_v12  ;;  %1131 = vmatprep.subr.bf16.mxu0 %v1378_v9 }
  0x24   :  { %1105 = vmatprep.mubr.msk.f32.mxu1 %vm78_vm0, %v69_v13  ;;  %v367_v13 = vld [vmem:[%s1548_s7 + $0x10] sm:$0xff] }
  0x26   :  { %1132 = vmatpush3.bf16.msra.mxu0 %v1378_v9 }
  0x27   :  { %1133 = vmatprep.subr.bf16.mxu0 %v1385_v10 }
  0x2a   :  { %1134 = vmatpush3.bf16.msra.mxu0 %v1385_v10 }
  0x2b   :  { %1161 = vmatprep.subr.bf16.mxu0 %v1330_v3 }
  0x87   :  { %v243_v43 = vpop.permute.xlu0 %242 }
  0x88   :  { %v253_v44 = vpop.permute.xlu1 %252 }
  0x8b   :  { %v248_v45 = vpop.permute.xlu0 %247 }
  0x8c   :  { %v258_v51 = vpop.permute.xlu1 %257 }
  0x8f   :  { %v524_v19 = vpop.permute.xlu0 %523 }
  0x90   :  { %v529_v18 = vpop.permute.xlu1 %528 }
  0x93   :  { %v534_v28 = vpop.permute.xlu0 %533 }
  0x94   :  { %v539_v25 = vpop.permute.xlu1 %538 }
  0xd6   :  { %v148_v29 = vpop.f32.mrb[0].mxu1 }
  0xd7   :  { %v1082_v30 = vpop.f32.mrb[1].mxu1 }
  0xde   :  { %v1115_v41 = vpop.f32.mrb[0].mxu0 }
  0xdf   :  { %v453_v42 = vpop.f32.mrb[1].mxu0 }
  0xe2   :  { %v1118_v61 = vpop.f32.mrb[2].mxu0 }
  0xe3   :  { %v463_v62 = vpop.f32.mrb[3].mxu0 }
  0xf6   :  { %v234_v31 = vpop.f32.mrb[4].mxu1 }
  0xf7   :  { %v235_v32 = vadd.f32 %v234_v31, %v148_v29  ;;  %v1101_v33 = vpop.f32.mrb[5].mxu1 }
  0xf8   :  { %v237_v34 = vpop.f32.mrb[6].mxu1 }
  0xf9   :  { %v1102_v36 = vpop.f32.mrb[7].mxu1  ;;  %1103 = vmatprep.subr.mxu1 %v235_v32 }
  0xfa   :  { %1104 = vmatpush3.msra.mxu1 %v235_v32 }
  0xfb   :  { %1106 = vmatmul.mubr.msk.f32.vlgmr.msra.gmra.mrb[2].mxu1 %vm78_vm0, %v70_v35 }
  0xfc   :  { %1108 = vmatprep.mubr.msk.f32.mxu1 %vm78_vm0, %v71_v37 }
  0xff   :  { %1109 = vmatmul.mubr.msk.f32.gmra.mrb[8].mxu1 %vm78_vm0, %v72_v38 }
 0x100   :  { %1147 = vmatprep.mubr.msk.f32.mxu1 %vm541_vm2, %v365_v63 }
 0x1ce   :  { %v1107_v46 = vpop.f32.mrb[2].mxu1 }
 0x1cf   :  { %v344_v47 = vadd.f32 %v1107_v46, %v248_v45  ;;  %v338_v48 = vpop.f32.mrb[3].mxu1 }
 0x1d0   :  { %v339_v49 = vadd.f32 %v338_v48, %v243_v43 }
 0x1d1   :  { %v358_v50 = vmax.f32 %v344_v47, 0.0 }
 0x1d2   :  { %v357_v52 = vmax.f32 %v339_v49, 0.0  ;;  %v1110_v53 = vpop.f32.mrb[8].mxu1 }
 0x1d3   :  { %v354_v54 = vadd.f32 %v1110_v53, %v258_v51  ;;  %v348_v55 = vpop.f32.mrb[9].mxu1  ;;  %v648_v51 = vld [vmem:[%s1550_s10 + $0x8] sm:$0xff]  ;;  %v807_v53 = vpop.permute.xlu1 %806 }
 0x1d4   :  { %v373_v56 = vpack.c.bf16 %v358_v50, %v357_v52  ;;  %v349_v57 = vadd.f32 %v348_v55, %v253_v44  ;;  %v1239_v52 = vmov 0.0|0.0   ;;  %v802_v55 = vpop.permute.xlu0 %801 }
 0x1d5   :  { %v360_v58 = vmax.f32 %v354_v54, 0.0 }
 0x1d6   :  { %v359_v59 = vmax.f32 %v349_v57, 0.0  ;;  %1135 = vmatprep.mubr.bf16.mxu0 %v373_v56 }
 0x1d8   :  { %v374_v60 = vpack.c.bf16 %v360_v58, %v359_v59 }
 0x1da   :  { %1136 = vmatmul.mubr.bf16.vlgmr.msra.gmra.mrb[4].mxu0 %v374_v60  ;;  %v890_v60 = vld [vmem:[%s1551_s12] sm:$0x1] }
 0x1db   :  { %1162 = vmatpush3.bf16.msra.mxu0 %v1330_v3 }
 0x1dc   :  { %1163 = vmatprep.subr.bf16.mxu0 %v1339_v4 }
 0x1df   :  { %1164 = vmatpush3.bf16.msra.mxu0 %v1339_v4 }
 0x1e0   :  { %1165 = vmatprep.subr.bf16.mxu0 %v1350_v5 }
 0x1e3   :  { %1166 = vmatpush3.bf16.msra.mxu0 %v1350_v5 }
 0x1e4   :  { %1167 = vmatprep.subr.bf16.mxu0 %v1357_v6 }
 0x1e7   :  { %1168 = vmatpush3.bf16.msra.mxu0 %v1357_v6 }
 0x1e8   :  { %1169 = vmatprep.subr.bf16.mxu0 %v1364_v7 }
 0x1eb   :  { %1170 = vmatpush3.bf16.msra.mxu0 %v1364_v7 }
 0x1ec   :  { %1171 = vmatprep.subr.bf16.mxu0 %v1371_v8 }
 0x1ef   :  { %1172 = vmatpush3.bf16.msra.mxu0 %v1371_v8 }
 0x1f0   :  { %1173 = vmatprep.subr.bf16.mxu0 %v1378_v9 }
 0x1f3   :  { %1174 = vmatpush3.bf16.msra.mxu0 %v1378_v9 }
 0x1f4   :  { %1175 = vmatprep.subr.bf16.mxu0 %v1385_v10 }
 0x1f7   :  { %1176 = vmatpush3.bf16.msra.mxu0 %v1385_v10  ;;  %v366_v10 = vld [vmem:[%s1548_s7 + $0x8] sm:$0xff] }
 0x2ad   :  { %v1137_v2 = vpop.f32.mrb[4].mxu0 }
 0x2ae   :  { %v515_v3 = vadd.f32 %v1137_v2, %v463_v62  ;;  %v506_v4 = vpop.f32.mrb[5].mxu0 }
 0x2af   :  { %v507_v5 = vadd.f32 %v506_v4, %v453_v42  ;;  %v1138_v6 = vpop.f32.mrb[6].mxu0 }
 0x2b0   :  { %v518_v7 = vadd.f32 %v1138_v6, %v1118_v61  ;;  %v509_v8 = vpop.f32.mrb[7].mxu0  ;;  %v897_v61 = vlaneseq }
 0x2b1   :  { %v510_v9 = vadd.f32 %v1115_v41, %v509_v8 }
 0x2b2   :  { %v1203_v11 = vpack.c.bf16 %v518_v7, %v515_v3  ;;  %v898_v62 = vshrl.u32 %v897_v61, 7 }
 0x2b3   :  { %v1199_v12 = vpack.c.bf16 %v510_v9, %v507_v5 }
 0x2b4   :  { %v899_v63 = vsub.s32 0, %v898_v62 }
 0x2b5   :  { %1200 = vmatprep.subr.bf16.mxu1 %v1199_v12 }
 0x2b6   :  { %1202 = vmatpush3.bf16.msra.mxu1 %v1199_v12 }
 0x2b7   :  { %1204 = vmatprep.subr.bf16.mxu1 %v1203_v11 }
 0x2ba   :  { %1206 = vmatpush3.bf16.msra.mxu1 %v1203_v11 }
 0x2bb   :  { %1153 = vmatprep.subr.mxu1 %v1319_v1 }
 0x2bd   :  { %1148 = vmatmul.mubr.msk.f32.vlgmr.msra.gmra.mrb[10].mxu1 %vm541_vm2, %v366_v10 }
 0x2be   :  { %1150 = vmatprep.mubr.msk.f32.mxu1 %vm541_vm2, %v367_v13  ;;  %1154 = vmatpush3.msra.mxu1 %v1319_v1  ;;  %v646_v1 = vld [vmem:[%s1549_s9 + $0x18] sm:$0xff] }
 0x2c1   :  { %1151 = vmatmul.mubr.msk.f32.gmra.mrb[12].mxu1 %vm541_vm2, %v368_v14 }
 0x2c2   :  { %1155 = vmatprep.mubr.msk.f32.mxu1 %vm78_vm0, %v643_v15 }
 0x2c5   :  { %1156 = vmatmul.mubr.msk.f32.vlgmr.msra.gmra.mrb[14].mxu1 %vm78_vm0, %v644_v16 }
 0x2c6   :  { %1158 = vmatprep.mubr.msk.f32.mxu1 %vm78_vm0, %v645_v17 }
 0x2c9   :  { %1159 = vmatmul.mubr.msk.f32.gmra.mrb[16].mxu1 %vm78_vm0, %v646_v1 }
 0x2ca   :  { %1189 = vmatprep.mubr.msk.f32.mxu1 %vm541_vm2, %v647_v40 }
 0x390   :  { %v1149_v20 = vpop.f32.mrb[10].mxu1 }
 0x391   :  { %v626_v21 = vadd.f32 %v1149_v20, %v529_v18  ;;  %v620_v22 = vpop.f32.mrb[11].mxu1 }
 0x392   :  { %v621_v23 = vadd.f32 %v620_v22, %v524_v19 }
 0x393   :  { %v640_v24 = vmax.f32 %v626_v21, 0.0 }
 0x394   :  { %v639_v26 = vmax.f32 %v621_v23, 0.0  ;;  %v1152_v27 = vpop.f32.mrb[12].mxu1 }
 0x395   :  { %v636_v29 = vadd.f32 %v1152_v27, %v539_v25  ;;  %v630_v30 = vpop.f32.mrb[13].mxu1 }
 0x396   :  { %v651_v31 = vpack.c.bf16 %v640_v24, %v639_v26  ;;  %v631_v32 = vadd.f32 %v630_v30, %v534_v28 }
 0x397   :  { %v642_v33 = vmax.f32 %v636_v29, 0.0 }
 0x398   :  { %v641_v34 = vmax.f32 %v631_v32, 0.0  ;;  %1177 = vmatprep.mubr.bf16.mxu0 %v651_v31  ;;  %v1157_v36 = vpop.f32.mrb[14].mxu1 }
 0x399   :  { %v731_v37 = vpop.f32.mrb[15].mxu1 }
 0x39a   :  { %v652_v35 = vpack.c.bf16 %v642_v33, %v641_v34 }
 0x39c   :  { %1178 = vmatmul.mubr.bf16.vlgmr.msra.gmra.mrb[8].mxu0 %v652_v35  ;;  %v1160_v38 = vpop.f32.mrb[16].mxu1 }
 0x39d   :  { %v741_v39 = vpop.f32.mrb[17].mxu1 }
 0x46f   :  { %v1179_v41 = vpop.f32.mrb[8].mxu0 }
 0x470   :  { %v793_v42 = vadd.f32 %v1179_v41, %v741_v39  ;;  %v784_v43 = vpop.f32.mrb[9].mxu0 }
 0x471   :  { %v785_v44 = vadd.f32 %v784_v43, %v731_v37  ;;  %v1180_v45 = vpop.f32.mrb[10].mxu0 }
 0x472   :  { %v796_v46 = vadd.f32 %v1180_v45, %v1160_v38  ;;  %v787_v47 = vpop.f32.mrb[11].mxu0 }
 0x473   :  { %v788_v48 = vadd.f32 %v1157_v36, %v787_v47 }
 0x474   :  { %v1211_v49 = vpack.c.bf16 %v796_v46, %v793_v42 }
 0x475   :  { %v1207_v50 = vpack.c.bf16 %v788_v48, %v785_v44 }
 0x477   :  { %1208 = vmatprep.subr.bf16.mxu1 %v1207_v50 }
 0x478   :  { %1210 = vmatpush3.bf16.msra.mxu1 %v1207_v50 }
 0x479   :  { %1212 = vmatprep.subr.bf16.mxu1 %v1211_v49 }
 0x47c   :  { %1214 = vmatpush3.bf16.msra.mxu1 %v1211_v49 }
 0x47d   :  { %1215 = vmatprep.subr.bf16.mxu1 %v1239_v52 }
 0x47f   :  { %1190 = vmatmul.mubr.msk.f32.vlgmr.msra.gmra.mrb[18].mxu1 %vm541_vm2, %v648_v51 }
 0x480   :  { %1196 = vmatprep.mubr.msk.f32.mxu1 %vm1237_vm1, %v1236_v0  ;;  %v895_v0 = vpop.permute.xlu0 %894 }
 0x481   :  { %v900_v2 = vrot.slane %v895_v0, %v899_v63 }
 0x552   :  { %v1191_v54 = vpop.f32.mrb[18].mxu1 }
 0x553   :  { %v887_v56 = vadd.f32 %v1191_v54, %v807_v53  ;;  %v881_v57 = vpop.f32.mrb[19].mxu1 }
 0x554   :  { %v882_v58 = vadd.f32 %v881_v57, %v802_v55 }
 0x556   :  { %v1216_v59 = vpack.c.bf16 %v887_v56, %v882_v58 }
 0x558   :  { %1217 = vmatpush3.bf16.msra.mxu1 %v1216_v59 }
 0x55b   :  { %1197 = vmatmul.mubr.msk.f32.vlgmr.msra.gmra.mrb[20].mxu1 %vm901_vm3, %v890_v60 }
 0x62e   :  { %v971_v3 = vpop.f32.mrb[20].mxu1 }
 0x62f   :  { %v972_v4 = vadd.f32 %v971_v3, %v900_v2  ;;  %v1198_v5 = vpop.f32.mrb[21].mxu1 }
 0x631   :  { %v1014_v6 = vmul.f32 -1.442695, %v972_v4 }
 0x633   :  { %1232 = vpow2.f32 %v1014_v6 }
 0x63d   :  { %v1233_v7 = vpop.eup %1232 }
 0x63e   :  { %v978_v8 = vadd.f32 1.0, %v1233_v7 }
 0x640   :  { %1234 = vrcp.f32 %v978_v8 }
 0x64a   :  { %v1235_v9 = vpop.eup %1234 }
 0x64b   :  { %981 = vst [vmem:[%s1552_s14] sm:$0x1] %v1235_v9 }

</bundles_post_ra>
